<compile_context>
chip_gen: v6e
topology: v6e:2x2x1
jax: 0.10.0
libtpu: 0.0.40
codegen_flags: <defaults>
</compile_context>

<pallas_src>
import functools

import jax
import jax.numpy as jnp
from jax.experimental import pallas as pl
from jax.experimental.pallas import tpu as pltpu


# -----------------------------------------------------------------------------
# Kernel
# -----------------------------------------------------------------------------
def _rope_kernel(tab_ref, q_ref, k_ref, qo_ref, ko_ref, *, half, mode):
    """Apply RoPE to one (TB, TN, L) tile of q and k.

    tab_ref planes (f32), selected by `mode` (static):
      "roll"   : [cos, sign-folded sin]                          L == D, D % 128 == 0
      "packed" : [cos, +sin masked to 2nd half of each D-group,
                       -sin masked to 1st half of each D-group]  L == 128, D < 128
      "split"  : [cos, sign-folded sin]                          generic fallback
    """
    L = q_ref.shape[-1]

    if mode == "roll":
        # rotate_half == lane roll by D/2 (exact because the roll axis length is D).
        cos = tab_ref[0]           # (TN, L) f32 — loaded once, shared by q and k
        sin_signed = tab_ref[1]    # (TN, L) f32 == [-sin | +sin]

        def _apply(x_ref, o_ref):
            x = x_ref[...].astype(jnp.float32)                      # (TB, TN, L)
            rot = pltpu.roll(x, shift=half, axis=2)
            o_ref[...] = (x * cos + rot * sin_signed).astype(o_ref.dtype)

    elif mode == "packed":
        # D < 128; G = 128 // D positions per 128-lane row.  rotate_half must stay
        # inside each D-sized lane group, so use two lane rolls + pre-masked sin:
        #   out = x*cos + roll(x, +D/2)*s_a + roll(x, 128 - D/2)*s_b
        # (s_a is zero where roll(+D/2) crosses a group boundary, s_b likewise).
        cos = tab_ref[0]
        s_a = tab_ref[1]           # +sin on the 2nd half of each group, else 0
        s_b = tab_ref[2]           # -sin on the 1st half of each group, else 0

        def _apply(x_ref, o_ref):
            x = x_ref[...].astype(jnp.float32)                      # (TB, TN, 128)
            xa = pltpu.roll(x, shift=half, axis=2)
            xb = pltpu.roll(x, shift=L - half, axis=2)
            o_ref[...] = (x * cos + xa * s_a + xb * s_b).astype(o_ref.dtype)

    else:  # "split" fallback (D not a divisor/multiple of 128)
        cos_h = tab_ref[0][:, :half]        # hoisted: shared by q and k
        sin_h = tab_ref[1][:, half:]
        # TODO(synk): assemble the full-D result in-register and issue a single
        # store once minor-dim concatenate is verified for these odd head dims.

        def _apply(x_ref, o_ref):
            x = x_ref[...].astype(jnp.float32)
            x1 = x[:, :, :half]
            x2 = x[:, :, half:]
            o_ref[:, :, :half] = (x1 * cos_h - x2 * sin_h).astype(o_ref.dtype)
            o_ref[:, :, half:] = (x2 * cos_h + x1 * sin_h).astype(o_ref.dtype)

    _apply(q_ref, qo_ref)
    _apply(k_ref, ko_ref)


# -----------------------------------------------------------------------------
# Tiling helpers
# -----------------------------------------------------------------------------
def _vmem_capacity_bytes():
    try:
        return int(pltpu.get_tpu_info().vmem_capacity_bytes)
    except Exception:
        return 64 * 1024 * 1024          # conservative floor (v7x)


def _pick_block(extent, cap, quantum):
    """Block size for one dim: full extent if it fits, otherwise the largest
    multiple of `quantum` <= cap, preferring one that divides `extent` (no
    ragged last block) as long as it is >= cap/2."""
    if extent <= cap:
        return extent
    cap = max(quantum, (cap // quantum) * quantum)
    d = cap
    floor = max(quantum, cap // 2)
    while d >= floor:
        if extent % d == 0:
            return d
        d -= quantum
    return cap


def _choose_tiles(rows, np_, L, itemsize, vmem_phys):
    # Per-stream I/O tile target: ~1-2 MiB per buffer (near HBM roofline),
    # generation aware (v7x only has 64 MiB physical VMEM).
    target_io_bytes = (2 << 20) if vmem_phys >= (96 << 20) else (1 << 20)

    # Sequence-axis block: keep <= ~256 KiB of f32 working set per tile "row"
    # (bounds the in-kernel f32 upcast / roll temporaries); sublane quantum is
    # 8 for f32, 16 for bf16, ...
    quantum = max(8, 32 // max(1, itemsize))
    tn_cap = max(quantum, (256 * 1024) // (L * 4))
    tn = _pick_block(np_, tn_cap, quantum)
    gj = pl.cdiv(np_, tn)

    # Rows-axis block: fill the per-stream budget but keep >= 4 total grid
    # steps when possible (software pipelining + v7x megacore sharding).
    tb_cap = max(1, target_io_bytes // (tn * L * itemsize))
    needed_gi = max(1, pl.cdiv(4, gj))
    tb_cap = min(tb_cap, max(1, rows // needed_gi))
    tb = _pick_block(rows, tb_cap, 1)
    return tb, tn


# -----------------------------------------------------------------------------
# Wrapper
# -----------------------------------------------------------------------------
def rotary_position_embedding(q, k, *, theta=10000, scale_base=4096):
    """Matches RotaryPositionEmbedding.forward: returns (q_rot, k_rot).

    q, k: (B, H, N, D) arrays (D even).  Outputs keep the input dtype.
    """
    B, H, N, D = q.shape
    assert k.shape == (B, H, N, D)
    assert D % 2 == 0
    half = D // 2

    # ---- _update_cos_sin_tables (glue, plain JAX, f32 like the autocast) ----
    inv_freq = 1.0 / (theta ** (jnp.arange(0, D, 2, dtype=jnp.float32) / D))
    t = jnp.arange(N, dtype=jnp.float32) * (scale_base / N)
    freqs = jnp.einsum("i,j->ij", t, inv_freq)                  # (N, D//2)
    emb = jnp.concatenate([freqs, freqs], axis=-1)              # (N, D)
    cos = jnp.cos(emb)
    sin = jnp.sin(emb)
    d_idx = jnp.arange(D)

    # ---- pick the kernel layout ---------------------------------------------
    rows = B * H
    if D % 128 == 0:
        mode, L, np_ = "roll", D, N
        sign = jnp.where(d_idx < half, -1.0, 1.0).astype(jnp.float32)
        table = jnp.stack([cos, sin * sign], axis=0)                       # (2, N, D)
    elif 128 % D == 0 and (N * D) % 128 == 0:
        # Lane-dense repack: (N, D) -> (N*D/128, 128); free (contiguous) reshape.
        mode, L, np_ = "packed", 128, (N * D) // 128
        s_a = jnp.where(d_idx >= half, sin, 0.0)     # feeds roll(x, +D/2)
        s_b = jnp.where(d_idx < half, -sin, 0.0)     # feeds roll(x, 128 - D/2)
        table = jnp.stack([cos, s_a, s_b], axis=0).reshape(3, np_, L)
    else:
        mode, L, np_ = "split", D, N
        sign = jnp.where(d_idx < half, -1.0, 1.0).astype(jnp.float32)
        table = jnp.stack([cos, sin * sign], axis=0)

    planes = table.shape[0]
    qf = q.reshape(rows, np_, L)     # contiguous -> free reshape, keeps dtype
    kf = k.reshape(rows, np_, L)

    # ---- tiling / grid -------------------------------------------------------
    itemsize = max(q.dtype.itemsize, k.dtype.itemsize)
    vmem_phys = _vmem_capacity_bytes()
    tb, tn = _choose_tiles(rows, np_, L, itemsize, vmem_phys)
    gj, gi = pl.cdiv(np_, tn), pl.cdiv(rows, tb)

    # Sequence axis outermost: the table block index only changes with j, so it
    # is (re-)fetched gj times total; rows axis innermost streams q/k/outputs.
    grid = (gj, gi)
    table_spec = pl.BlockSpec((planes, tn, L), lambda j, i: (0, j, 0))
    tile_spec = pl.BlockSpec((tb, tn, L), lambda j, i: (i, j, 0))

    kernel = functools.partial(_rope_kernel, half=half, mode=mode)
    n_elems = rows * np_ * L
    cost = pl.CostEstimate(
        flops=12 * n_elems,                                   # ~6 flops/elem, q and k
        transcendentals=0,
        bytes_accessed=4 * n_elems * itemsize + planes * np_ * L * 4,
    )

    q_out, k_out = pl.pallas_call(
        kernel,
        out_shape=(
            jax.ShapeDtypeStruct((rows, np_, L), q.dtype),
            jax.ShapeDtypeStruct((rows, np_, L), k.dtype),
        ),
        grid_spec=pltpu.PrefetchScalarGridSpec(
            num_scalar_prefetch=0,
            grid=grid,
            in_specs=[table_spec, tile_spec, tile_spec],
            out_specs=[tile_spec, tile_spec],
        ),
        compiler_params=pltpu.CompilerParams(
            dimension_semantics=("parallel", "parallel"),
            # Generation-aware scoped VMEM: 96 MiB on v5e/v6e (128 MiB physical),
            # 48 MiB on v7x (64 MiB physical) / unknown.
            vmem_limit_bytes=int(min(vmem_phys * 3 // 4, 96 * 1024 * 1024)),
        ),
        cost_estimate=cost,
    )(table, qf, kf)

    return q_out.reshape(B, H, N, D), k_out.reshape(B, H, N, D)


# -----------------------------------------------------------------------------
# Pure-JAX reference mirroring the PyTorch module
# -----------------------------------------------------------------------------
def _rope_reference(q, k, *, theta=10000, scale_base=4096):
    B, H, N, D = q.shape
    inv_freq = 1.0 / (theta ** (jnp.arange(0, D, 2, dtype=jnp.float32) / D))
    t = jnp.arange(N, dtype=jnp.float32) * (scale_base / N)
    freqs = jnp.einsum("i,j->ij", t, inv_freq)
    emb = jnp.concatenate([freqs, freqs], axis=-1)
    cos = jnp.cos(emb)[None, None]
    sin = jnp.sin(emb)[None, None]

    def rotate_half(x):
        x1, x2 = jnp.split(x, 2, axis=-1)
        return jnp.concatenate([-x2, x1], axis=-1)

    def apply(x):
        return x * cos + rotate_half(x) * sin

    return apply(q), apply(k)


if __name__ == "__main__":
    key = jax.random.PRNGKey(0)

    def _check(B, H, N, D, dtype, tol):
        k1, k2 = jax.random.split(jax.random.fold_in(key, D))
        q = jax.random.normal(k1, (B, H, N, D), dtype=jnp.float32).astype(dtype)
        kk = jax.random.normal(k2, (B, H, N, D), dtype=jnp.float32).astype(dtype)

        q_rot, k_rot = rotary_position_embedding(q, kk)
        jax.block_until_ready((q_rot, k_rot))

        q_ref, k_ref = _rope_reference(q, kk)
        assert q_rot.dtype == dtype and k_rot.dtype == dtype
        assert jnp.allclose(q_rot.astype(jnp.float32), q_ref.astype(jnp.float32),
                            atol=tol, rtol=tol)
        assert jnp.allclose(k_rot.astype(jnp.float32), k_ref.astype(jnp.float32),
                            atol=tol, rtol=tol)

    # Primary module-scale shape: head_dim=32, seq=8 -> packed lane-dense path.
    _check(2, 4, 8, 32, jnp.float32, 1e-5)
    # Exercise the D % 128 == 0 single-roll path.
    _check(1, 2, 8, 128, jnp.float32, 1e-5)
    # Common head_dim=64 in bf16 -> packed path with bf16 I/O.
    _check(2, 2, 16, 64, jnp.bfloat16, 3e-2)

    print("KERNEL_OK")
</pallas_src>

<mosaic_0001>
module attributes {stable_mosaic.version = 11 : i64} {
  func.func @_rope_kernel(%arg0: i32, %arg1: i32, %arg2: memref<3x2x128xf32, #tpu.memory_space<vmem>>, %arg3: memref<2x2x128xf32, #tpu.memory_space<vmem>>, %arg4: memref<2x2x128xf32, #tpu.memory_space<vmem>>, %arg5: memref<2x2x128xf32, #tpu.memory_space<vmem>>, %arg6: memref<2x2x128xf32, #tpu.memory_space<vmem>>) attributes {dimension_semantics = [#tpu.dimension_semantics<parallel>, #tpu.dimension_semantics<parallel>], iteration_bounds = array<i64: 1, 4>, scalar_prefetch = 0 : i64, scratch_operands = 0 : i64, tpu.core_type = #tpu.core_type<tc>, window_params = [{transform_indices = @transform_0, window_bounds = array<i64: 3, 2, 128>}, {transform_indices = @transform_1, window_bounds = array<i64: 2, 2, 128>}, {transform_indices = @transform_2, window_bounds = array<i64: 2, 2, 128>}, {transform_indices = @transform_3, window_bounds = array<i64: 2, 2, 128>}, {transform_indices = @transform_4, window_bounds = array<i64: 2, 2, 128>}]} {
    %c0 = arith.constant 0 : index
    %c0_0 = arith.constant 0 : index
    %c0_1 = arith.constant 0 : index
    %0 = vector.load %arg2[%c0, %c0_0, %c0_1] : memref<3x2x128xf32, #tpu.memory_space<vmem>>, vector<1x2x128xf32>
    %1 = vector.shape_cast %0 : vector<1x2x128xf32> to vector<2x128xf32>
    %c1 = arith.constant 1 : index
    %c0_2 = arith.constant 0 : index
    %c0_3 = arith.constant 0 : index
    %2 = vector.load %arg2[%c1, %c0_2, %c0_3] : memref<3x2x128xf32, #tpu.memory_space<vmem>>, vector<1x2x128xf32>
    %3 = vector.shape_cast %2 : vector<1x2x128xf32> to vector<2x128xf32>
    %c2 = arith.constant 2 : index
    %c0_4 = arith.constant 0 : index
    %c0_5 = arith.constant 0 : index
    %4 = vector.load %arg2[%c2, %c0_4, %c0_5] : memref<3x2x128xf32, #tpu.memory_space<vmem>>, vector<1x2x128xf32>
    %5 = vector.shape_cast %4 : vector<1x2x128xf32> to vector<2x128xf32>
    %c0_6 = arith.constant 0 : index
    %c0_7 = arith.constant 0 : index
    %c0_8 = arith.constant 0 : index
    %6 = vector.load %arg3[%c0_6, %c0_7, %c0_8] : memref<2x2x128xf32, #tpu.memory_space<vmem>>, vector<2x2x128xf32>
    %c16_i32 = arith.constant 16 : i32
    %7 = tpu.dynamic_rotate %6 by %c16_i32 dim 2 : vector<2x2x128xf32>, i32 -> vector<2x2x128xf32>
    %c112_i32 = arith.constant 112 : i32
    %8 = tpu.dynamic_rotate %6 by %c112_i32 dim 2 : vector<2x2x128xf32>, i32 -> vector<2x2x128xf32>
    %9 = vector.shape_cast %1 : vector<2x128xf32> to vector<1x2x128xf32>
    %10 = vector.broadcast %9 : vector<1x2x128xf32> to vector<2x2x128xf32>
    %11 = arith.mulf %6, %10 : vector<2x2x128xf32>
    %12 = vector.shape_cast %3 : vector<2x128xf32> to vector<1x2x128xf32>
    %13 = vector.broadcast %12 : vector<1x2x128xf32> to vector<2x2x128xf32>
    %14 = arith.mulf %7, %13 : vector<2x2x128xf32>
    %15 = arith.addf %11, %14 : vector<2x2x128xf32>
    %16 = vector.shape_cast %5 : vector<2x128xf32> to vector<1x2x128xf32>
    %17 = vector.broadcast %16 : vector<1x2x128xf32> to vector<2x2x128xf32>
    %18 = arith.mulf %8, %17 : vector<2x2x128xf32>
    %19 = arith.addf %15, %18 : vector<2x2x128xf32>
    %c0_9 = arith.constant 0 : index
    %c0_10 = arith.constant 0 : index
    %c0_11 = arith.constant 0 : index
    %20 = vector.load %arg5[%c0_9, %c0_10, %c0_11] : memref<2x2x128xf32, #tpu.memory_space<vmem>>, vector<2x2x128xf32>
    tpu.vector_store %arg5[%c0_9, %c0_10, %c0_11], %19 {strides = array<i32>} : memref<2x2x128xf32, #tpu.memory_space<vmem>>, vector<2x2x128xf32>,
    %c0_12 = arith.constant 0 : index
    %c0_13 = arith.constant 0 : index
    %c0_14 = arith.constant 0 : index
    %21 = vector.load %arg4[%c0_12, %c0_13, %c0_14] : memref<2x2x128xf32, #tpu.memory_space<vmem>>, vector<2x2x128xf32>
    %c16_i32_15 = arith.constant 16 : i32
    %22 = tpu.dynamic_rotate %21 by %c16_i32_15 dim 2 : vector<2x2x128xf32>, i32 -> vector<2x2x128xf32>
    %c112_i32_16 = arith.constant 112 : i32
    %23 = tpu.dynamic_rotate %21 by %c112_i32_16 dim 2 : vector<2x2x128xf32>, i32 -> vector<2x2x128xf32>
    %24 = vector.shape_cast %1 : vector<2x128xf32> to vector<1x2x128xf32>
    %25 = vector.broadcast %24 : vector<1x2x128xf32> to vector<2x2x128xf32>
    %26 = arith.mulf %21, %25 : vector<2x2x128xf32>
    %27 = vector.shape_cast %3 : vector<2x128xf32> to vector<1x2x128xf32>
    %28 = vector.broadcast %27 : vector<1x2x128xf32> to vector<2x2x128xf32>
    %29 = arith.mulf %22, %28 : vector<2x2x128xf32>
    %30 = arith.addf %26, %29 : vector<2x2x128xf32>
    %31 = vector.shape_cast %5 : vector<2x128xf32> to vector<1x2x128xf32>
    %32 = vector.broadcast %31 : vector<1x2x128xf32> to vector<2x2x128xf32>
    %33 = arith.mulf %23, %32 : vector<2x2x128xf32>
    %34 = arith.addf %30, %33 : vector<2x2x128xf32>
    %c0_17 = arith.constant 0 : index
    %c0_18 = arith.constant 0 : index
    %c0_19 = arith.constant 0 : index
    %35 = vector.load %arg6[%c0_17, %c0_18, %c0_19] : memref<2x2x128xf32, #tpu.memory_space<vmem>>, vector<2x2x128xf32>
    tpu.vector_store %arg6[%c0_17, %c0_18, %c0_19], %34 {strides = array<i32>} : memref<2x2x128xf32, #tpu.memory_space<vmem>>, vector<2x2x128xf32>,
    return
  }
  func.func @transform_0(%arg0: i32, %arg1: i32) -> (i32, i32, i32) {
    %c0_i32 = arith.constant 0 : i32
    %c0_i32_0 = arith.constant 0 : i32
    %c0_i32_1 = arith.constant 0 : i32
    return %c0_i32, %arg0, %c0_i32_0 : i32, i32, i32
  }
  func.func @transform_1(%arg0: i32, %arg1: i32) -> (i32, i32, i32) {
    %c0_i32 = arith.constant 0 : i32
    %c0_i32_0 = arith.constant 0 : i32
    return %arg1, %arg0, %c0_i32 : i32, i32, i32
  }
  func.func @transform_2(%arg0: i32, %arg1: i32) -> (i32, i32, i32) {
    %c0_i32 = arith.constant 0 : i32
    %c0_i32_0 = arith.constant 0 : i32
    return %arg1, %arg0, %c0_i32 : i32, i32, i32
  }
  func.func @transform_3(%arg0: i32, %arg1: i32) -> (i32, i32, i32) {
    %c0_i32 = arith.constant 0 : i32
    %c0_i32_0 = arith.constant 0 : i32
    return %arg1, %arg0, %c0_i32 : i32, i32, i32
  }
  func.func @transform_4(%arg0: i32, %arg1: i32) -> (i32, i32, i32) {
    %c0_i32 = arith.constant 0 : i32
    %c0_i32_0 = arith.constant 0 : i32
    return %arg1, %arg0, %c0_i32 : i32, i32, i32
  }
}

</mosaic_0001>

<bundles_post_ra>
// kernel: tpu_custom_call.1
= control target key start
LH: loop header
LB: loop body
LE: loop exit
PB: predicated region body
PF: predicated region fallthrough
CT: control target
= control target key end

     0   :  { %10 = vsyncpa [#allocation3], 0  ;;  %s1160_s0 = inlined_call_operand.hbm [shape: f32[3,2,128], index: 0, kind: input, shape index: {}]   ;;  %s1161_s1 = inlined_call_operand.hbm [shape: f32[8,2,128], index: 1, kind: input, shape index: {}]   ;;  %s1162_s2 = inlined_call_operand.hbm [shape: f32[8,2,128], index: 2, kind: input, shape index: {}]   ;;  %s1163_s3 = inlined_call_operand.hbm [shape: f32[8,2,128], index: 3, kind: output, shape index: {0}]   ;;  %s1164_s4 = inlined_call_operand.hbm [shape: f32[8,2,128], index: 4, kind: output, shape index: {1}]  }
   0x1   :  { %11 = vsyncpa [#allocation6], 0 }
   0x2   :  { %13 = vsyncpa [#allocation6 + $0x1], 0 }
   0x3   :  { %14 = vsyncpa [#allocation4], 0 }
   0x4   :  { %16 = vsyncpa [#allocation4 + $0x1], 0 }
   0x5   :  { %17 = vsyncpa [#allocation10], 0 }
   0x6   :  { %19 = vsyncpa [#allocation10 + $0x1], 0  ;;  %s905_s15 = smov 0   ;;  %s907_s16 = smov 0  }
   0x7   :  { %s909_s17 = smov 0   ;;  %s911_s18 = smov 0  }
   0x8   :  { %s913_s19 = smov 0   ;;  %s915_s20 = smov 0  }
   0x9 LB: > { %s34_s21 = sadd.s32 1, %s863_s19  ;;  %s72_s22 = sadd.s32 1, %s855_s17  ;;  %s867_s20 = sphi %s915_s20, %s25_s20   ;;  %s863_s19 = sphi %s913_s19, %s1182_s19   ;;  %s859_s18 = sphi %s911_s18, %s1181_s18   ;;  %s855_s17 = sphi %s909_s17, %s1180_s17   ;;  %s851_s16 = sphi %s907_s16, %s1179_s16   ;;  %s847_s15 = sphi %s905_s15, %s1178_s15  }
   0xa   : > { %p35_p0 = scmp.ge.s32.totalorder %s34_s21, 4  ;;  %p79_p1 = scmp.ne.s32.totalorder %s855_s17, %s851_s16 }
   0xb   : > { %p80_p2 = scmp.eq.s32.totalorder %s867_s20, 0  ;;  %p613_p5 = scmp.lt.s32.totalorder %s867_s20, 4 }
   0xc   : > { %s1184_s21 = smov (%p35_p0, %s34_s21), 0  ;;  %s208_s25 = sand.u32 1, %s867_s20  }
   0xd   : > { %p945_p3 = por %p80_p2, %p79_p1  ;;  %s67_s24 = ssub.s32 %s863_s19, %s1184_s21 }
   0xe   : > { %p70_p4 = scmp.eq.s32.totalorder %s67_s24, 0  ;;  %s210_s26 = sand.u32 1, %s855_s17  }
   0xf   : > { %s957_s28 = sshll.u32 %s210_s26, 2  ;;  %s578_s29 = sshll.u32 %s863_s19, 6 }
  0x10   : > { %s955_s27 = scalar_select %p70_p4, %s855_s17, %s72_s22  }
  0x11   : > { %s219_s6 = scalar_lea.hbm %s1161_s1, %s578_s29  ;;  %s212_s7 = scalar_lea.vmem [#allocation5], %s957_s28 }
  0x12   : > { %s220_s8 = sshll.u32 %s212_s7, 4  ;;  %p966_p6 = pnand %p613_p5, %p945_p3  ;;  %s221_s8 = int_to_ptr.vmem [resolvable:$true] %s220_s8 }
  0x13   : > { %s973_s12 = scalar_lea.hbm %s1162_s2, %s578_s29  ;;  %s975_s13 = scalar_lea.sflag [#allocation6], %s208_s25 }
  0x14   : > { %p673_p7 = pneg %p966_p6  ;;  %s684_s14 = scalar_lea.vmem %s221_s8, 64 }
  0x15   : > { %p685_p8 = scmp.ne.s32.totalorder %s221_s8, %s684_s14  ;;  %s869_s22 = smov [#allocation5]  }
  0x16   : > { %s689_s23 = sshll.u32 %s869_s22, 4  ;;  %s690_s23 = int_to_ptr.vmem [resolvable:$false] %s689_s23 }
  0x17   : > { %p687_p9 = pnand %p685_p8, %p673_p7  ;;  %s691_s24 = scalar_lea.vmem %s690_s23, 128 }
  0x18   : > { %p692_p11 = scmp.lt.s32.totalorder %s221_s8, %s690_s23  ;;  %p693_p12 = scmp.lt.s32.totalorder %s691_s24, %s684_s14 }
  0x19   : > { %p688_p10 = pneg %p687_p9 }
  0x1a   : > { %p694_p13 = por %p693_p12, %p692_p11 }
  0x1c   : > { %p695_p0 = pnand %p694_p13, %p688_p10 }
  0x1e   : > { %698 = shalt.err (!%p695_p0)
}
  0x1f   : > { %s870_s26 = smov 32   ;;  %s871_s25 = smov 2  }
  0x20   : > { %601 = dma.hbm_to_vmem [thread:$0]  (!%p966_p6), %s219_s6, 64, %s221_s8, %s975_s13, %s870_s26, %s870_s26, %s871_s25  }
  0x21   : > { %s234_s29 = scalar_lea.vmem [#allocation7], %s957_s28  ;;  %s990_s5 = sadd.s32 4294967295, %s867_s20  }
  0x22   : > { %s242_s30 = sshll.u32 %s234_s29, 4  ;;  %s554_s7 = sadd.s32 4294967294, %s867_s20   ;;  %s243_s30 = int_to_ptr.vmem [resolvable:$true] %s242_s30 }
  0x23   : > { %p85_p2 = scmp.ne.s32.totalorder %s851_s16, %s847_s15  ;;  %p1165_p3 = scmp.eq.s32.totalorder %s990_s5, 0 }
  0x24   : > { %p139_p4 = scmp.eq.s32.totalorder %s990_s5, 3  ;;  %p145_p5 = scmp.eq.s32.totalorder %s554_s7, 3 }
  0x25   : > { %p555_p8 = scmp.ge.s32.totalorder %s867_s20, 1  ;;  %p1000_p9 = por %p1165_p3, %p85_p2 }
  0x26   : > { %p1007_p10 = por %p139_p4, %p79_p1  ;;  %p1011_p11 = por %p145_p5, %p85_p2 }
  0x27   : > { %p180_p12 = scmp.lt.s32.totalorder %s867_s20, 5  ;;  %s872_s11 = smov [#allocation2]  }
  0x28   : > { %s1170_s28 = scalar_select %p1007_p10, 1, 0 }
  0x29   : > { %s1171_s6 = scalar_select %p1011_p11, 1, 0 }
  0x2a   : > { %p1016_p13 = pnand %p555_p8, %p180_p12  ;;  %s194_s14 = sshll.u32 %s872_s11, 4  ;;  %s195_s14 = int_to_ptr.vmem [resolvable:$true] %s194_s14 }
  0x2b   : > { %s712_s22 = scalar_lea.vmem %s243_s30, 64  ;;  %s873_s23 = smov [#allocation7]  }
  0x2c   : > { %p594_p0 = pneg %p1016_p13  ;;  %p713_p1 = scmp.ne.s32.totalorder %s243_s30, %s712_s22 }
  0x2d   : > { %s717_s24 = sshll.u32 %s873_s23, 4  ;;  %s718_s24 = int_to_ptr.vmem [resolvable:$false] %s717_s24 }
  0x2e   : > { %p715_p4 = pnand %p713_p1, %p673_p7  ;;  %s719_s29 = scalar_lea.vmem %s718_s24, 128 }
  0x2f   : > { %p720_p5 = scmp.lt.s32.totalorder %s243_s30, %s718_s24  ;;  %p721_p8 = scmp.lt.s32.totalorder %s719_s29, %s712_s22 }
  0x30   : > { %p716_p2 = pneg %p715_p4 }
  0x31   : > { %p722_p12 = por %p721_p8, %p720_p5 }
  0x33   : > { %p723_p3 = pnand %p722_p12, %p716_p2 }
  0x35   : > { %726 = shalt.err (!%p723_p3)
}
  0x36   : > { %604 = dma.hbm_to_vmem [thread:$0]  (!%p966_p6), %s973_s12, 64, %s243_s30, %s975_s13, %s870_s26, %s870_s26, %s871_s25  }
  0x37   : > { %p1173_p7 = scmp.eq.s32.totalorder %s990_s5, 0  ;;  %s738_s7 = scalar_lea.vmem %s195_s14, 96 }
  0x38   : > { %p739_p5 = scmp.ne.s32.totalorder %s195_s14, %s738_s7  ;;  %p746_p8 = scmp.lt.s32.totalorder %s195_s14, %s195_s14 }
  0x39   : > { %p595_p1 = pnand %p594_p0, %p1173_p7  ;;  %p747_p12 = scmp.lt.s32.totalorder %s738_s7, %s738_s7 }
  0x3b   : > { %p729_p4 = pneg %p595_p1  ;;  %p748_p11 = por %p747_p12, %p746_p8 }
  0x3d   : > { %p741_p2 = pnand %p739_p5, %p729_p4 }
  0x3f   : > { %p742_p3 = pneg %p741_p2 }
  0x41   : > { %p749_p10 = pnand %p748_p11, %p742_p3 }
  0x43   : > { %752 = shalt.err (!%p749_p10)
}
  0x44   : > { %597 = dma.hbm_to_vmem [thread:$0]  (!%p595_p1), %s1160_s0, 96, %s195_s14, [#allocation3], %s870_s26, %s870_s26, %s871_s25  }
  0x45   : > { %254 = sbr.rel (%p1016_p13) target bundleno = 244 (0xf4), region = 32  ;;  %p1174_p6 = scmp.eq.s32.totalorder (!%p1016_p13), %s990_s5, 0 }
  0x4a   : > { %830 = dma.done.wait (%p1174_p6), [#allocation3], 96   ;;  %p1175_p0 = pmov %p1174_p6 }
  0x4b   : > { %s260_s13 = sand.u32 1, %s990_s5   ;;  %s1051_s30 = sand.u32 1, %s851_s16  }
  0x4c   : > { %832 = vsyncadd (%p1175_p0), [#allocation3], 4294967200  ;;  %s1054_s11 = sshll.u32 %s1051_s30, 2  ;;  %s261_s26 = scalar_lea.sflag [#allocation6], %s260_s13 }
  0x4d   : > { %s264_s25 = scalar_lea.vmem [#allocation5], %s1054_s11 }
  0x4e   : > { %834 = dma.done.wait (%p1000_p9), %s261_s26, 128  }
  0x4f   : > { %836 = vsyncadd (%p1000_p9), %s261_s26, 4294967168  ;;  %s273_s8 = scalar_lea.vmem [#allocation7], %s1054_s11  ;;  %v317_v1 = vld [vmem:[%s264_s25] sm:$0x3]  ;;  %s874_s14 = smov 16  }
  0x50   : > { %v339_v0 = vld [vmem:[%s273_s8] sm:$0x3]  ;;  %319 = vrot.lane.b32.xlu0 %v317_v1, %s874_s14  ;;  %v340_v2 = vld [vmem:[%s273_s8 + $0x2] sm:$0x3]  ;;  %v318_v3 = vld [vmem:[%s264_s25 + $0x2] sm:$0x3] }
  0x51   : > { %341 = vrot.lane.b32.xlu1 %v339_v0, %s874_s14  ;;  %s875_s5 = smov 112   ;;  %v312_v6 = vld [vmem:[#allocation2] sm:$0x3]  ;;  %v314_v7 = vld [vmem:[#allocation2 + $0x2] sm:$0x3]  ;;  %s300_s10 = scalar_lea.vmem [#allocation8], %s1054_s11 }
  0x52   : > { %v327_v8 = vmul.f32 %v317_v1, %v312_v6  ;;  %v328_v12 = vmul.f32 %v318_v3, %v312_v6  ;;  %s381_s22 = sshll.u32 %s300_s10, 4  ;;  %v316_v14 = vld [vmem:[#allocation2 + $0x4] sm:$0x3]  ;;  %s580_s23 = sshll.u32 %s859_s18, 6  ;;  %v349_v15 = vmul.f32 %v339_v0, %v312_v6  ;;  %v350_v16 = vmul.f32 %v340_v2, %v312_v6  ;;  %s1064_s22 = int_to_ptr.vmem [resolvable:$true] %s381_s22 }
  0x53   : > { %s1067_s24 = scalar_lea.vmem [#allocation9], %s1054_s11  ;;  %s1075_s12 = scalar_lea.hbm %s1163_s3, %s580_s23 }
  0x54   : > { %321 = vrot.lane.b32.xlu0 %v318_v3, %s874_s14  ;;  %s398_s29 = sshll.u32 %s1067_s24, 4  ;;  %s362_s13 = scalar_lea.sflag [#allocation4], %s1051_s30  ;;  %s1077_s29 = int_to_ptr.vmem [resolvable:$true] %s398_s29 }
  0x55   : > { %343 = vrot.lane.b32.xlu1 %v340_v2, %s874_s14  ;;  %s753_s11 = scalar_lea.vmem %s1064_s22, 64  ;;  %p1176_p10 = scmp.ne.s32.totalorder %s1170_s28, 0 }
  0x56   : > { %p754_p9 = scmp.ne.s32.totalorder %s1064_s22, %s753_s11  ;;  %s876_s26 = smov [#allocation8]  }
  0x57   : > { %s757_s25 = sshll.u32 %s876_s26, 4  ;;  %s758_s25 = int_to_ptr.vmem [resolvable:$false] %s757_s25 }
  0x58   : > { %323 = vrot.lane.b32.xlu0 %v317_v1, %s875_s5  ;;  %p755_p11 = pnand %p754_p9, %p1176_p10  ;;  %s759_s8 = scalar_lea.vmem %s758_s25, 128 }
  0x59   : > { %325 = vrot.lane.b32.xlu1 %v318_v3, %s875_s5  ;;  %p760_p7 = scmp.lt.s32.totalorder %s1064_s22, %s758_s25  ;;  %p761_p1 = scmp.lt.s32.totalorder %s759_s8, %s753_s11 }
  0x5a   : > { %p756_p13 = pneg %p755_p11 }
  0x5b   : > { %p762_p4 = por %p761_p1, %p760_p7 }
  0x5c   : > { %345 = vrot.lane.b32.xlu0 %v339_v0, %s875_s5 }
  0x5d   : > { %347 = vrot.lane.b32.xlu1 %v340_v2, %s875_s5  ;;  %p763_p5 = pnand %p762_p4, %p756_p13 }
  0xc2   : > { %v320_v5 = vpop.permute.xlu0 %319 }
  0xc3   : > { %v342_v4 = vpop.permute.xlu1 %341  ;;  %v329_v9 = vmul.f32 %v320_v5, %v314_v7 }
  0xc4   : > { %v351_v17 = vmul.f32 %v342_v4, %v314_v7 }
  0xc5   : > { %v331_v18 = vadd.f32 %v329_v9, %v327_v8 }
  0xc6   : > { %v322_v11 = vpop.permute.xlu0 %321  ;;  %v353_v29 = vadd.f32 %v351_v17, %v349_v15 }
  0xc7   : > { %v344_v10 = vpop.permute.xlu1 %343  ;;  %v330_v13 = vmul.f32 %v322_v11, %v314_v7 }
  0xc8   : > { %v352_v21 = vmul.f32 %v344_v10, %v314_v7 }
  0xc9   : > { %v332_v22 = vadd.f32 %v330_v13, %v328_v12 }
  0xca   : > { %v324_v20 = vpop.permute.xlu0 %323  ;;  %v354_v30 = vadd.f32 %v352_v21, %v350_v16 }
  0xcb   : > { %v326_v19 = vpop.permute.xlu1 %325  ;;  %v333_v24 = vmul.f32 %v324_v20, %v316_v14 }
  0xcc   : > { %v334_v23 = vmul.f32 %v326_v19, %v316_v14 }
  0xcd   : > { %v335_v26 = vadd.f32 %v333_v24, %v331_v18 }
  0xce   : > { %v336_v25 = vadd.f32 %v334_v23, %v332_v22  ;;  %v346_v28 = vpop.permute.xlu0 %345 }
  0xcf   : > { %v348_v27 = vpop.permute.xlu1 %347  ;;  %337 = vst [vmem:[%s300_s10] sm:$0x3] %v335_v26  ;;  %v355_v32 = vmul.f32 %v346_v28, %v316_v14 }
  0xd0   : > { %338 = vst [vmem:[%s300_s10 + $0x2] sm:$0x3] %v336_v25  ;;  %v356_v31 = vmul.f32 %v348_v27, %v316_v14 }
  0xd1   : > { %766 = shalt.err (!%p763_p5)
}
  0xd2   : > { %s767_s14 = scalar_lea.hbm %s1075_s12, 64  ;;  %s771_s7 = scalar_lea.hbm %s1163_s3, 256 }
  0xd3   : > { %p768_p2 = scmp.ne.s32.totalorder %s1075_s12, %s767_s14  ;;  %p772_p12 = scmp.lt.s32.totalorder %s1075_s12, %s1163_s3 }
  0xd4   : > { %p773_p6 = scmp.lt.s32.totalorder %s771_s7, %s767_s14 }
  0xd5   : > { %p769_p3 = pnand %p768_p2, %p1176_p10 }
  0xd6   : > { %p774_p0 = por %p773_p6, %p772_p12 }
  0xd7   : > { %p770_p8 = pneg %p769_p3 }
  0xd9   : > { %p775_p9 = pnand %p774_p0, %p770_p8 }
  0xdb   : > { %778 = shalt.err (!%p775_p9)
}
  0xdc   : > { %s877_s11 = smov 32   ;;  %s878_s25 = smov 2   ;;  %v358_v33 = vadd.f32 %v356_v31, %v354_v30  ;;  %v357_v34 = vadd.f32 %v355_v32, %v353_v29 }
  0xdd   : > { %590 = dma.vmem_to_hbm [thread:$0]  (%p1176_p10), %s1064_s22, 64, %s1075_s12, %s362_s13, %s877_s11, %s877_s11, %s878_s25  }
  0xde   : > { %s1110_s5 = scalar_lea.hbm %s1164_s4, %s580_s23  ;;  %360 = vst [vmem:[%s1067_s24 + $0x2] sm:$0x3] %v358_v33  ;;  %359 = vst [vmem:[%s1067_s24] sm:$0x3] %v357_v34  ;;  %s367_s10 = scalar_lea.sflag [#allocation10], %s1051_s30 }
  0xdf   : > { %s779_s7 = scalar_lea.vmem %s1077_s29, 64  ;;  %s879_s9 = smov [#allocation9]  }
  0xe0   : > { %p780_p11 = scmp.ne.s32.totalorder %s1077_s29, %s779_s7  ;;  %s783_s26 = sshll.u32 %s879_s9, 4  ;;  %s784_s26 = int_to_ptr.vmem [resolvable:$false] %s783_s26 }
  0xe1   : > { %s785_s22 = scalar_lea.vmem %s784_s26, 128  ;;  %p786_p1 = scmp.lt.s32.totalorder %s1077_s29, %s784_s26 }
  0xe2   : > { %p781_p13 = pnand %p780_p11, %p1176_p10  ;;  %p787_p4 = scmp.lt.s32.totalorder %s785_s22, %s779_s7 }
  0xe4   : > { %p782_p7 = pneg %p781_p13  ;;  %p788_p5 = por %p787_p4, %p786_p1 }
  0xe6   : > { %p789_p2 = pnand %p788_p5, %p782_p7 }
  0xe8   : > { %792 = shalt.err (!%p789_p2)
}
  0xe9   : > { %s793_s18 = scalar_lea.hbm %s1110_s5, 64  ;;  %s797_s24 = scalar_lea.hbm %s1164_s4, 256 }
  0xea   : > { %p794_p3 = scmp.ne.s32.totalorder %s1110_s5, %s793_s18  ;;  %p798_p6 = scmp.lt.s32.totalorder %s1110_s5, %s1164_s4 }
  0xeb   : > { %p799_p0 = scmp.lt.s32.totalorder %s797_s24, %s793_s18 }
  0xec   : > { %p795_p8 = pnand %p794_p3, %p1176_p10 }
  0xed   : > { %p800_p9 = por %p799_p0, %p798_p6 }
  0xee   : > { %p796_p12 = pneg %p795_p8 }
  0xf0   : > { %p801_p11 = pnand %p800_p9, %p796_p12 }
  0xf2   : > { %804 = shalt.err (!%p801_p11)
}
  0xf3   : > { %591 = dma.vmem_to_hbm [thread:$0]  (%p1176_p10), %s1077_s29, 64, %s1110_s5, %s367_s10, %s877_s11, %s877_s11, %s878_s25  }
  0xf4 PF: > { %p615_p13 = scmp.ge.s32.totalorder %s867_s20, 2  ;;  %s413_s8 = sand.u32 1, %s847_s15  }
  0xf5   : > { %p1177_p7 = scmp.ne.s32.totalorder %s1171_s6, 0  ;;  %s414_s14 = scalar_lea.sflag [#allocation4], %s413_s8 }
  0xf7   : > { %p606_p1 = pnand %p615_p13, %p1177_p7 }
  0xf9   : > { %p607_p4 = pneg %p606_p1 }
  0xfb   : > { %838 = dma.done.wait (%p607_p4), %s414_s14, 64  }
  0xfc   : > { %840 = vsyncadd (%p607_p4), %s414_s14, 4294967232  ;;  %s423_s7 = scalar_lea.sflag [#allocation10], %s413_s8 }
  0xfd   : > { %842 = dma.done.wait (%p607_p4), %s423_s7, 64  }
  0xfe   : > { %844 = vsyncadd (%p607_p4), %s423_s7, 4294967232  ;;  %s25_s20 = sadd.s32 1, %s867_s20   ;;  %s1178_s15 = smov %s851_s16 }
  0xff   : > { %p22_p5 = scmp.ge.s32.totalorder %s25_s20, 6   ;;  %s1179_s16 = smov %s855_s17 }
 0x100   : > { %s1180_s17 = smov %s955_s27  ;;  %s1181_s18 = smov %s863_s19 }
 0x101   : > { %s1182_s19 = smov %s1184_s21  ;;  %24 = sbr.rel (!%p22_p5) target bundleno = 9 (0x9), region = 113 }
 0x106   :  { %428 = vsyncpa [#allocation3], 1 }
 0x107   :  { %430 = vsyncpa [#allocation3 + $0x1], 1 }
 0x108   :  { %431 = vsyncpa [#allocation6], 1 }
 0x109   :  { %433 = vsyncpa [#allocation6 + $0x1], 1 }
 0x10a   :  { %434 = vsyncpa [#allocation4], 1 }
 0x10b   :  { %436 = vsyncpa [#allocation4 + $0x1], 1 }
 0x10c   :  { %437 = vsyncpa [#allocation10], 1 }
 0x10d   :  { %439 = vsyncpa [#allocation10 + $0x1], 1 }

</bundles_post_ra>
